<compile_context>
chip_gen: v6e
topology: v6e:2x2x1
jax: 0.10.0
libtpu: 0.0.40
codegen_flags: <defaults>
</compile_context>

<pallas_src>
import jax
import jax.numpy as jnp
from jax.experimental import pallas as pl
from jax.experimental.pallas import tpu as pltpu


HIDDEN_PAD = 128  # lane-aligned padded hidden size (100 -> 128)


def _round_up(n, m):
    return ((n + m - 1) // m) * m


def mlp_kernel(x_ref, w1_ref, b1_ref, w2_ref, b2_ref, o_ref):
    x = x_ref[...]
    w1 = w1_ref[...]
    if w1.dtype == jnp.bfloat16:
        # Perf path: single-pass bf16 MXU matmul, f32 accumulate.
        h = jnp.dot(x.astype(jnp.bfloat16), w1,
                    preferred_element_type=jnp.float32)
    else:
        # Exact path: pin precision so the f32 matmul lowering (and its
        # numerics) is deterministic across compiler versions / generations.
        h = jnp.dot(x, w1, precision=jax.lax.Precision.HIGHEST,
                    preferred_element_type=jnp.float32)
    # bias + ReLU on the VPU (full lane-aligned vregs thanks to hidden padding).
    h = jnp.maximum(h + b1_ref[...], 0.0)
    # fc2: VPU multiply with the broadcast w2 row + XLU lane reduction (avoids
    # a degenerate N=1 MXU matmul). Natural (tile_b, 1) output block.
    out = jnp.sum(h * w2_ref[...], axis=-1, keepdims=True) + b2_ref[0]
    o_ref[...] = out.astype(o_ref.dtype)


def pack_params(w1, b1, w2, b2, hidden_pad=HIDDEN_PAD, use_bf16=False):
    """One-time packing: transpose + zero-pad hidden to a lane-aligned width.

    w1: (hidden, dim), b1: (hidden,), w2: (1, hidden), b2: (1,).
    Zero-padded hidden columns contribute exactly 0 to the output
    (relu(x@0 + 0) * 0 == 0), so semantics are unchanged.
    """
    hidden, dim = w1.shape
    f32 = jnp.float32
    w1_t = jnp.zeros((dim, hidden_pad), f32).at[:, :hidden].set(w1.astype(f32).T)
    if use_bf16:
        # Optional perf path: single-pass MXU matmul, ~1e-3 relative error.
        w1_t = w1_t.astype(jnp.bfloat16)
    b1_row = jnp.zeros((1, hidden_pad), f32).at[0, :hidden].set(b1.astype(f32))
    w2_row = jnp.zeros((1, hidden_pad), f32).at[0, :hidden].set(w2[0].astype(f32))
    b2_s = b2.reshape(1).astype(f32)
    return w1_t, b1_row, w2_row, b2_s


def network_u_forward(x, packed_params, *, tile_b=4096):
    """x: (B, dim); packed_params from pack_params(). Returns (B, 1)."""
    B, dim = x.shape
    w1_t, b1_row, w2_row, b2_s = packed_params
    hidden_pad = w1_t.shape[1]

    # Batch tile: as large as practical (amortizes per-grid-step overhead), but
    # capped so the grid keeps >= 2 steps when B allows -> v7x can shard the
    # "parallel" axis across both TensorCores. Always a sublane multiple (8).
    tile_b = max(8, min(tile_b, _round_up(pl.cdiv(B, 2), 8)))
    num_tiles = pl.cdiv(B, tile_b)

    # VMEM budget: the (tile_b, 32) f32 x block is lane-padded to 128 lanes
    # (tile_b*128*4 B); count double-buffered input + output block + ~2x for
    # the h / h*w2 intermediates, plus weight tiles. Clamp to v7x's 64 MiB.
    tile_bytes = tile_b * 128 * 4
    vmem_limit = int(min(max(8 * tile_bytes + (2 << 20), 32 << 20), 64 << 20))

    out = pl.pallas_call(
        mlp_kernel,
        out_shape=jax.ShapeDtypeStruct((B, 1), x.dtype),
        grid=(num_tiles,),
        in_specs=[
            pl.BlockSpec((tile_b, dim), lambda i: (i, 0)),        # x tile
            pl.BlockSpec((dim, hidden_pad), lambda i: (0, 0)),    # w1_t (resident)
            pl.BlockSpec((1, hidden_pad), lambda i: (0, 0)),      # b1 row (resident)
            pl.BlockSpec((1, hidden_pad), lambda i: (0, 0)),      # w2 row (resident)
            pl.BlockSpec(memory_space=pltpu.MemorySpace.SMEM),    # b2 scalar
        ],
        out_specs=pl.BlockSpec((tile_b, 1), lambda i: (i, 0)),
        compiler_params=pltpu.CompilerParams(
            dimension_semantics=("parallel",),
            vmem_limit_bytes=vmem_limit,
        ),
    )(x, w1_t, b1_row, w2_row, b2_s)
    return out


def reference_forward(x, w1, b1, w2, b2):
    h = jnp.maximum(x @ w1.T + b1, 0.0)
    return h @ w2.T + b2


if __name__ == "__main__":
    # Small shapes consistent with the module: Network_u(dim=32, hidden_size=100)
    B, dim, hidden = 8, 32, 100

    key = jax.random.PRNGKey(0)
    kx, kw1, kb1, kw2, kb2 = jax.random.split(key, 5)

    x = jax.random.normal(kx, (B, dim), dtype=jnp.float32)

    # Deterministic parameter init (uniform, PyTorch-Linear-style bounds).
    bound1 = 1.0 / (dim ** 0.5)
    w1 = jax.random.uniform(kw1, (hidden, dim), jnp.float32, -bound1, bound1)
    b1 = jax.random.uniform(kb1, (hidden,), jnp.float32, -bound1, bound1)
    bound2 = 1.0 / (hidden ** 0.5)
    w2 = jax.random.uniform(kw2, (1, hidden), jnp.float32, -bound2, bound2)
    b2 = jax.random.uniform(kb2, (1,), jnp.float32, -bound2, bound2)

    # Pack / pre-transpose weights once (hoisted out of the per-call path).
    # Exact f32 path (keeps the 1e-5 tolerance); use_bf16=True is the perf path.
    packed = pack_params(w1, b1, w2, b2)

    out = network_u_forward(x, packed)
    jax.block_until_ready(out)

    ref = reference_forward(x, w1, b1, w2, b2)
    assert out.shape == (B, 1), out.shape
    assert jnp.allclose(out, ref, atol=1e-5, rtol=1e-5), "mismatch vs reference"

    print("KERNEL_OK")
</pallas_src>

<mosaic_0001>
module attributes {stable_mosaic.version = 11 : i64} {
  func.func @mlp_kernel(%arg0: i32, %arg1: memref<8x32xf32, #tpu.memory_space<vmem>>, %arg2: memref<32x128xf32, #tpu.memory_space<vmem>>, %arg3: memref<1x128xf32, #tpu.memory_space<vmem>>, %arg4: memref<1x128xf32, #tpu.memory_space<vmem>>, %arg5: memref<1xf32, #tpu.memory_space<smem>>, %arg6: memref<8x1xf32, #tpu.memory_space<vmem>>) attributes {dimension_semantics = [#tpu.dimension_semantics<parallel>], iteration_bounds = array<i64: 1>, scalar_prefetch = 0 : i64, scratch_operands = 0 : i64, tpu.core_type = #tpu.core_type<tc>, window_params = [{transform_indices = @transform_0, window_bounds = array<i64: 8, 32>}, {pipeline_mode = #tpu.pipeline_mode<synchronous>, transform_indices = @transform_1, window_bounds = array<i64: 32, 128>}, {pipeline_mode = #tpu.pipeline_mode<synchronous>, transform_indices = @transform_2, window_bounds = array<i64: 1, 128>}, {pipeline_mode = #tpu.pipeline_mode<synchronous>, transform_indices = @transform_3, window_bounds = array<i64: 1, 128>}, {transform_indices = @transform_4, window_bounds = array<i64: 1>}, {transform_indices = @transform_5, window_bounds = array<i64: 8, 1>}]} {
    %c0 = arith.constant 0 : index
    %c0_0 = arith.constant 0 : index
    %0 = vector.load %arg1[%c0, %c0_0] : memref<8x32xf32, #tpu.memory_space<vmem>>, vector<8x32xf32>
    %c0_1 = arith.constant 0 : index
    %c0_2 = arith.constant 0 : index
    %1 = vector.load %arg2[%c0_1, %c0_2] : memref<32x128xf32, #tpu.memory_space<vmem>>, vector<32x128xf32>
    %cst = arith.constant dense<0.000000e+00> : vector<8x128xf32>
    %2 = tpu.matmul %0, %1, %cst {dimension_numbers = #tpu.dot_dimension_numbers<[1], [0], [0], [1], [0, 0, 1, 1], [], []>, precision = #tpu.contract_precision<fp32>} : vector<8x32xf32>, vector<32x128xf32>, vector<8x128xf32> -> vector<8x128xf32>
    %c0_3 = arith.constant 0 : index
    %c0_4 = arith.constant 0 : index
    %3 = vector.load %arg3[%c0_3, %c0_4] : memref<1x128xf32, #tpu.memory_space<vmem>>, vector<1x128xf32>
    %4 = vector.broadcast %3 : vector<1x128xf32> to vector<8x128xf32>
    %5 = arith.addf %2, %4 : vector<8x128xf32>
    %cst_5 = arith.constant 0.000000e+00 : f32
    %6 = vector.broadcast %cst_5 : f32 to vector<8x128xf32>
    %7 = arith.maximumf %5, %6 : vector<8x128xf32>
    %c0_6 = arith.constant 0 : index
    %c0_7 = arith.constant 0 : index
    %8 = vector.load %arg4[%c0_6, %c0_7] : memref<1x128xf32, #tpu.memory_space<vmem>>, vector<1x128xf32>
    %9 = vector.broadcast %8 : vector<1x128xf32> to vector<8x128xf32>
    %10 = arith.mulf %7, %9 : vector<8x128xf32>
    %cst_8 = arith.constant dense<0.000000e+00> : vector<8xf32>
    %11 = vector.multi_reduction <add>, %10, %cst_8 [1] : vector<8x128xf32> to vector<8xf32>
    %12 = vector.shape_cast %11 : vector<8xf32> to vector<8x1xf32>
    %c0_9 = arith.constant 0 : index
    %13 = memref.load %arg5[%c0_9] : memref<1xf32, #tpu.memory_space<smem>>
    %14 = vector.broadcast %13 : f32 to vector<8x1xf32>
    %15 = arith.addf %12, %14 : vector<8x1xf32>
    %c0_10 = arith.constant 0 : index
    %c0_11 = arith.constant 0 : index
    %16 = vector.load %arg6[%c0_10, %c0_11] : memref<8x1xf32, #tpu.memory_space<vmem>>, vector<8x1xf32>
    tpu.vector_store %arg6[%c0_10, %c0_11], %15 {strides = array<i32>} : memref<8x1xf32, #tpu.memory_space<vmem>>, vector<8x1xf32>,
    return
  }
  func.func @transform_0(%arg0: i32) -> (i32, i32) {
    %c0_i32 = arith.constant 0 : i32
    %c0_i32_0 = arith.constant 0 : i32
    return %arg0, %c0_i32 : i32, i32
  }
  func.func @transform_1(%arg0: i32) -> (i32, i32) {
    %c0_i32 = arith.constant 0 : i32
    %c0_i32_0 = arith.constant 0 : i32
    %c0_i32_1 = arith.constant 0 : i32
    return %c0_i32, %c0_i32_0 : i32, i32
  }
  func.func @transform_2(%arg0: i32) -> (i32, i32) {
    %c0_i32 = arith.constant 0 : i32
    %c0_i32_0 = arith.constant 0 : i32
    %c0_i32_1 = arith.constant 0 : i32
    return %c0_i32, %c0_i32_0 : i32, i32
  }
  func.func @transform_3(%arg0: i32) -> (i32, i32) {
    %c0_i32 = arith.constant 0 : i32
    %c0_i32_0 = arith.constant 0 : i32
    %c0_i32_1 = arith.constant 0 : i32
    return %c0_i32, %c0_i32_0 : i32, i32
  }
  func.func @transform_4(%arg0: i32) -> i32 {
    %c0_i32 = arith.constant 0 : i32
    %c0_i32_0 = arith.constant 0 : i32
    return %c0_i32 : i32
  }
  func.func @transform_5(%arg0: i32) -> (i32, i32) {
    %c0_i32 = arith.constant 0 : i32
    %c0_i32_0 = arith.constant 0 : i32
    return %arg0, %c0_i32 : i32, i32
  }
}

</mosaic_0001>

<bundles_post_ra>
// kernel: tpu_custom_call.1
= control target key start
LH: loop header
LB: loop body
LE: loop exit
PB: predicated region body
PF: predicated region fallthrough
CT: control target
= control target key end

     0   :  { %11 = vsyncpa [#allocation4], 0  ;;  %s838_s0 = inlined_call_operand.hbm [shape: f32[8,32], index: 0, kind: input, shape index: {}]   ;;  %s839_s1 = inlined_call_operand.hbm [shape: f32[32,128], index: 1, kind: input, shape index: {}]   ;;  %s840_s2 = inlined_call_operand.vmem [shape: f32[1,128], index: 2, kind: input, shape index: {}]   ;;  %s841_s3 = inlined_call_operand.vmem [shape: f32[1,128], index: 3, kind: input, shape index: {}]   ;;  %s842_s4 = inlined_call_operand.<no memory space> [shape: f32[1], index: 4, kind: input, shape index: {}]   ;;  %s843_s5 = inlined_call_operand.vmem [shape: f32[8,1], index: 5, kind: output, shape index: {}]  }
   0x1   :  { %12 = vsyncpa [#allocation6], 0  ;;  %s718_s18 = smov [#allocation3]   ;;  %s719_s20 = smov [#allocation5]  }
   0x2   :  { %s19_s19 = sshll.u32 %s718_s18, 4  ;;  %s28_s21 = sshll.u32 %s719_s20, 4  ;;  %s20_s19 = int_to_ptr.vmem [resolvable:$true] %s19_s19  ;;  %s29_s21 = int_to_ptr.vmem [resolvable:$true] %s28_s21 }
   0x3   :  { %s682_s22 = scalar_lea.vmem %s20_s19, 128  ;;  %p687_p1 = scmp.lt.s32.totalorder %s20_s19, %s20_s19 }
   0x4   :  { %p683_p0 = scmp.ne.s32.totalorder %s20_s19, %s682_s22  ;;  %p688_p2 = scmp.lt.s32.totalorder %s682_s22, %s682_s22 }
   0x6   :  { %p689_p3 = por %p688_p2, %p687_p1 }
   0x8   :  { %p690_p4 = pnand %p689_p3, %p683_p0 }
   0xa   :  { %693 = shalt.err (!%p690_p4)
}
   0xb   :  { %22 = dma.hbm_to_vmem [thread:$0]  %s838_s0, 128, %s20_s19, [#allocation4]  }
   0xc   :  { %s702_s25 = scalar_lea.vmem %s29_s21, 512  ;;  %p707_p6 = scmp.lt.s32.totalorder %s29_s21, %s29_s21 }
   0xd   :  { %p703_p5 = scmp.ne.s32.totalorder %s29_s21, %s702_s25  ;;  %p708_p7 = scmp.lt.s32.totalorder %s702_s25, %s702_s25 }
   0xf   :  { %p709_p8 = por %p708_p7, %p707_p6 }
  0x11   :  { %p710_p9 = pnand %p709_p8, %p703_p5 }
  0x13   :  { %713 = shalt.err (!%p710_p9)
}
  0x14   :  { %s720_s26 = smov 128   ;;  %s721_s27 = smov 8  }
  0x15   :  { %34 = dma.hbm_to_vmem [thread:$0]  %s839_s1, 512, %s29_s21, [#allocation6], %s720_s26, %s720_s26, %s721_s27  }
  0x16   :  { %714 = dma.done.wait [#allocation4], 128  }
  0x17   :  { %715 = vsyncadd [#allocation4], 4294967168 }
  0x18   :  { %716 = dma.done.wait [#allocation6], 512  }
  0x19   :  { %717 = vsyncadd [#allocation6], 4294966784  ;;  %v722_v0 = vmov 0.0   ;;  %vm723_vm0 = vmmov 0   ;;  %vm59_vm1 = vcmask 261120   ;;  %v51_v1 = vld [vmem:[#allocation5 + $0x18] sm:$0xff]  ;;  %v560_v54 = vstv %s842_s4 }
  0x1a   :  { %602 = vmatprep.subr.mxu0 %v722_v0  ;;  %613 = vmatprep.subr.mxu1 %v722_v0  ;;  %v50_v2 = vld [vmem:[#allocation5 + $0x10] sm:$0xff]  ;;  %v49_v3 = vld [vmem:[#allocation5 + $0x8] sm:$0xff]  ;;  %v766_v4 = vand.u32 4294901760, %v51_v1  ;;  %v48_v7 = vld [vmem:[#allocation5] sm:$0xff]  ;;  %vm562_vm2 = vcmask 7168  }
  0x1b   :  { %610 = vmatprep.mubr.msk.f32.mxu0 %vm723_vm0, %v722_v0  ;;  %621 = vmatprep.mubr.msk.f32.mxu1 %vm723_vm0, %v722_v0  ;;  %v768_v5 = vand.u32 4294901760, %v50_v2  ;;  %v770_v6 = vand.u32 4294901760, %v49_v3  ;;  %v47_v8 = vld [vmem:[#allocation3] sm:$0xff]  ;;  %v772_v9 = vand.u32 4294901760, %v48_v7 }
  0x1c   :  { %v61_v10 = vsel %vm59_vm1, %v47_v8, 0  ;;  %603 = vmatpush3.msra.mxu0 %v766_v4  ;;  %v168_v11 = vsub.f32 %v51_v1, %v766_v4  ;;  %v570_v35 = vld [vmem:[%s840_s2] ss:$0 sm:$0xff] }
  0x1d   :  { %v776_v12 = vand.u32 4294901760, %v61_v10  ;;  %v175_v13 = vsub.f32 %v50_v2, %v768_v5  ;;  %v182_v14 = vsub.f32 %v49_v3, %v770_v6  ;;  %604 = vmatprep.subr.mxu0 %v722_v0  ;;  %v189_v15 = vsub.f32 %v48_v7, %v772_v9  ;;  %v571_v51 = vld [vmem:[%s841_s3] ss:$0 sm:$0xff] }
  0x1e   :  { %605 = vmatpush3.msra.mxu0 %v768_v5  ;;  %v169_v16 = vand.u32 4294901760, %v168_v11 }
  0x1f   :  { %v133_v17 = vsub.f32 %v61_v10, %v776_v12  ;;  %v176_v18 = vand.u32 4294901760, %v175_v13  ;;  %v183_v19 = vand.u32 4294901760, %v182_v14  ;;  %606 = vmatprep.subr.mxu0 %v722_v0  ;;  %v190_v20 = vand.u32 4294901760, %v189_v15 }
  0x20   :  { %607 = vmatpush3.msra.mxu0 %v770_v6  ;;  %v170_v21 = vsub.f32 %v168_v11, %v169_v16 }
  0x21   :  { %v134_v22 = vand.u32 4294901760, %v133_v17  ;;  %v177_v23 = vsub.f32 %v175_v13, %v176_v18  ;;  %v184_v24 = vsub.f32 %v182_v14, %v183_v19  ;;  %608 = vmatprep.subr.mxu0 %v722_v0  ;;  %v191_v28 = vsub.f32 %v189_v15, %v190_v20 }
  0x22   :  { %609 = vmatpush3.msra.mxu0 %v772_v9  ;;  %v171_v25 = vand.u32 4294901760, %v170_v21 }
  0x23   :  { %v135_v26 = vsub.f32 %v133_v17, %v134_v22  ;;  %v178_v27 = vand.u32 4294901760, %v177_v23  ;;  %624 = vmatprep.subr.mxu0 %v722_v0  ;;  %v185_v30 = vand.u32 4294901760, %v184_v24  ;;  %v192_v31 = vand.u32 4294901760, %v191_v28 }
  0x24   :  { %614 = vmatpush3.msra.mxu1 %v171_v25 }
  0x25   :  { %v136_v29 = vand.u32 4294901760, %v135_v26  ;;  %615 = vmatprep.subr.mxu1 %v722_v0 }
  0x26   :  { %616 = vmatpush3.msra.mxu1 %v178_v27 }
  0x27   :  { %611 = vmatmul.mubr.f32.vlgmr.msra.gmra.mxu0 %v136_v29  ;;  %617 = vmatprep.subr.mxu1 %v722_v0 }
  0x28   :  { %625 = vmatpush3.msra.mxu0 %v168_v11  ;;  %618 = vmatpush3.msra.mxu1 %v185_v30 }
  0x29   :  { %626 = vmatprep.subr.mxu0 %v722_v0  ;;  %619 = vmatprep.subr.mxu1 %v722_v0 }
  0x2a   :  { %627 = vmatpush3.msra.mxu0 %v175_v13  ;;  %620 = vmatpush3.msra.mxu1 %v192_v31 }
  0x2b   :  { %628 = vmatprep.subr.mxu0 %v722_v0  ;;  %622 = vmatmul.mubr.f32.vlgmr.msra.gmra.mxu1 %v776_v12 }
  0x2c   :  { %629 = vmatpush3.msra.mxu0 %v182_v14  ;;  %635 = vmatprep.subr.mxu1 %v722_v0 }
  0x2d   :  { %630 = vmatprep.subr.mxu0 %v722_v0  ;;  %636 = vmatpush3.msra.mxu1 %v766_v4 }
  0x2e   :  { %631 = vmatpush3.msra.mxu0 %v189_v15  ;;  %632 = vmatprep.mubr.msk.f32.mxu0 %vm723_vm0, %v722_v0 }
  0x2f   :  { %637 = vmatprep.subr.mxu1 %v722_v0  ;;  %646 = vmatprep.subr.mxu0 %v722_v0 }
  0x30   :  { %633 = vmatmul.mubr.f32.vlgmr.msra.gmra.mxu0 %v133_v17  ;;  %638 = vmatpush3.msra.mxu1 %v768_v5 }
  0x31   :  { %647 = vmatpush3.msra.mxu0 %v169_v16  ;;  %639 = vmatprep.subr.mxu1 %v722_v0 }
  0x32   :  { %648 = vmatprep.subr.mxu0 %v722_v0  ;;  %640 = vmatpush3.msra.mxu1 %v770_v6 }
  0x33   :  { %649 = vmatpush3.msra.mxu0 %v176_v18  ;;  %641 = vmatprep.subr.mxu1 %v722_v0 }
  0x34   :  { %650 = vmatprep.subr.mxu0 %v722_v0  ;;  %642 = vmatpush3.msra.mxu1 %v772_v9 }
  0x35   :  { %643 = vmatprep.mubr.msk.f32.mxu1 %vm723_vm0, %v722_v0  ;;  %651 = vmatpush3.msra.mxu0 %v183_v19 }
  0x36   :  { %644 = vmatmul.mubr.f32.vlgmr.msra.gmra.mxu1 %v134_v22  ;;  %652 = vmatprep.subr.mxu0 %v722_v0 }
  0x37   :  { %657 = vmatprep.subr.mxu1 %v722_v0  ;;  %653 = vmatpush3.msra.mxu0 %v190_v20 }
  0x38   :  { %654 = vmatprep.mubr.msk.f32.mxu0 %vm723_vm0, %v722_v0  ;;  %658 = vmatpush3.msra.mxu1 %v766_v4 }
  0x39   :  { %655 = vmatmul.mubr.f32.vlgmr.msra.gmra.mxu0 %v776_v12  ;;  %659 = vmatprep.subr.mxu1 %v722_v0 }
  0x3a   :  { %665 = vmatprep.mubr.msk.f32.mxu1 %vm723_vm0, %v722_v0  ;;  %660 = vmatpush3.msra.mxu1 %v768_v5 }
  0x3b   :  { %661 = vmatprep.subr.mxu1 %v722_v0 }
  0x3c   :  { %662 = vmatpush3.msra.mxu1 %v770_v6 }
  0x3d   :  { %663 = vmatprep.subr.mxu1 %v722_v0 }
  0x3e   :  { %664 = vmatpush3.msra.mxu1 %v772_v9 }
  0x3f   :  { %666 = vmatmul.mubr.f32.vlgmr.msra.gmra.mxu1 %v776_v12 }
  0xe7   :  { %v138_v32 = vpop.f32.mrf.mxu0 }
  0xe8   :  { %v139_v38 = vadd.f32 %v570_v35, %v138_v32 }
  0xe9   :  { %v612_v33 = vpop.f32.mrf.mxu0 }
  0xeb   :  { %v229_v34 = vpop.f32.mrf.mxu1 }
  0xec   :  { %v230_v40 = vadd.f32 %v229_v34, %v139_v38 }
  0xed   :  { %v623_v36 = vpop.f32.mrf.mxu1 }
  0xf0   :  { %v309_v37 = vpop.f32.mrf.mxu0 }
  0xf1   :  { %v310_v43 = vadd.f32 %v309_v37, %v230_v40 }
  0xf2   :  { %v634_v39 = vpop.f32.mrf.mxu0 }
  0xf6   :  { %v386_v41 = vpop.f32.mrf.mxu1 }
  0xf7   :  { %v387_v45 = vadd.f32 %v386_v41, %v310_v43 }
  0xf8   :  { %v645_v42 = vpop.f32.mrf.mxu1 }
  0xf9   :  { %v469_v44 = vpop.f32.mrf.mxu0 }
  0xfa   :  { %v470_v47 = vadd.f32 %v469_v44, %v387_v45 }
  0xfb   :  { %v656_v46 = vpop.f32.mrf.mxu0 }
  0xff   :  { %v544_v48 = vpop.f32.mrf.mxu1 }
 0x100   :  { %v545_v49 = vadd.f32 %v544_v48, %v470_v47 }
 0x101   :  { %v667_v50 = vpop.f32.mrf.mxu1 }
 0x102   :  { %v548_v52 = vmax.f32 %v545_v49, 0.0 }
 0x104   :  { %v556_v53 = vmul.f32 %v571_v51, %v548_v52 }
 0x106   :  { %557 = vadd.xlane.f32.xlu0 %v556_v53 }
 0x18f   :  { %v558_v55 = vpop.xlane.xlu0 %557 }
 0x190   :  { %v561_v56 = vadd.f32 %v560_v54, %v558_v55 }
 0x192   :  { %563 = vst.msk [vmem:[%s843_s5] sm:$0xff] %vm562_vm2, %v561_v56 }
 0x193   :  { %568 = vsyncpa [#allocation4], 1 }
 0x194   :  { %569 = vsyncpa [#allocation6], 1 }

</bundles_post_ra>
